<compile_context>
chip_gen: v7x
topology: tpu7x:2x2x1
jax: 0.10.0
libtpu: 0.0.40
codegen_flags: <defaults>
</compile_context>

<pallas_src>
import functools

import jax
import jax.numpy as jnp
from jax.experimental import pallas as pl
from jax.experimental.pallas import tpu as pltpu


_LANE = 128                        # vreg lane width: last dim is a multiple of this
_TILE_ROWS = 2048                  # two-pass row tile: 2048*128*4B = 1 MiB f32 blocks
_SINGLE_PASS_MAX_BYTES = 8 << 20   # samples up to 8 MiB use the 2x-traffic single pass
_GROUP_TARGET_BYTES = 2 << 20      # target block size when grouping tiny samples
_VMEM_LIMIT_BYTES = 56 << 20       # explicit scoped-VMEM budget (fits v5e/v6e/v7x)


# ---------------------------------------------------------------------------
# Kernels
# ---------------------------------------------------------------------------
def _scale_block_kernel(x_ref, o_ref, *, min_r: float, max_r: float):
    """Single-pass path: G whole (lane-dense) samples per block, scaled in place.

    x_ref/o_ref: (G, rows, 128).  min/max are reduced per sample (axes 1, 2)
    directly in the input dtype (exact for min/max, no full f32 temp).
    """
    x_min = jnp.min(x_ref[...], axis=(1, 2), keepdims=True).astype(jnp.float32)
    x_max = jnp.max(x_ref[...], axis=(1, 2), keepdims=True).astype(jnp.float32)
    rng = x_max - x_min
    safe = jnp.where(rng > 0.0, rng, jnp.ones_like(rng))   # constant-tensor guard
    scale = (max_r - min_r) / safe                          # one scalar per sample
    o_ref[...] = ((x_ref[...].astype(jnp.float32) - x_min) * scale
                  + min_r).astype(o_ref.dtype)


def _minmax_partial_kernel(x_ref, mn_ref, mx_ref):
    """Two-pass path, pass 1: per-(sample, tile) partial min/max (fully parallel)."""
    x = x_ref[...]                                          # (1, tile_rows, 128)
    mn_ref[...] = jnp.min(x, axis=(0, 1, 2), keepdims=True).astype(jnp.float32)
    mx_ref[...] = jnp.max(x, axis=(0, 1, 2), keepdims=True).astype(jnp.float32)


def _apply_kernel(x_ref, mn_ref, mx_ref, o_ref, *, min_r: float, max_r: float):
    """Two-pass path, pass 2: elementwise rescale of one row tile."""
    x_min = mn_ref[...]                                     # (1, 1, 1) float32
    rng = mx_ref[...] - x_min
    safe = jnp.where(rng > 0.0, rng, jnp.ones_like(rng))
    scale = (max_r - min_r) / safe
    o_ref[...] = ((x_ref[...].astype(jnp.float32) - x_min) * scale
                  + min_r).astype(o_ref.dtype)


# ---------------------------------------------------------------------------
# pallas_call wrappers
# ---------------------------------------------------------------------------
def _scale_single_pass(x3, min_r, max_r, group):
    B, rows, lanes = x3.shape
    kernel = functools.partial(_scale_block_kernel, min_r=min_r, max_r=max_r)
    return pl.pallas_call(
        kernel,
        out_shape=jax.ShapeDtypeStruct(x3.shape, x3.dtype),
        grid=(B // group,),
        in_specs=[pl.BlockSpec((group, rows, lanes), lambda i: (i, 0, 0))],
        out_specs=pl.BlockSpec((group, rows, lanes), lambda i: (i, 0, 0)),
        compiler_params=pltpu.CompilerParams(
            dimension_semantics=("parallel",),
            vmem_limit_bytes=_VMEM_LIMIT_BYTES),
    )(x3)


def _scale_two_pass(x3, min_r, max_r, tile_rows):
    B, rows, lanes = x3.shape
    tiles = rows // tile_rows

    # Pass 1: per-(sample, tile) partial min/max, both grid axes parallel.
    part_mn, part_mx = pl.pallas_call(
        _minmax_partial_kernel,
        out_shape=(jax.ShapeDtypeStruct((B * tiles, 1, 1), jnp.float32),
                   jax.ShapeDtypeStruct((B * tiles, 1, 1), jnp.float32)),
        grid=(B, tiles),
        in_specs=[pl.BlockSpec((1, tile_rows, lanes), lambda b, t: (b, t, 0))],
        out_specs=(pl.BlockSpec((1, 1, 1), lambda b, t: (b * tiles + t, 0, 0)),
                   pl.BlockSpec((1, 1, 1), lambda b, t: (b * tiles + t, 0, 0))),
        compiler_params=pltpu.CompilerParams(
            dimension_semantics=("parallel", "parallel"),
            vmem_limit_bytes=_VMEM_LIMIT_BYTES),
    )(x3)
    # Trivial combine of the tiny partials in XLA.
    mn = part_mn.reshape(B, tiles).min(axis=1).reshape(B, 1, 1)
    mx = part_mx.reshape(B, tiles).max(axis=1).reshape(B, 1, 1)

    # Pass 2: tiled elementwise rescale (lane-dense 128-wide blocks).
    kernel = functools.partial(_apply_kernel, min_r=min_r, max_r=max_r)
    return pl.pallas_call(
        kernel,
        out_shape=jax.ShapeDtypeStruct(x3.shape, x3.dtype),
        grid=(B, tiles),
        in_specs=[pl.BlockSpec((1, tile_rows, lanes), lambda b, t: (b, t, 0)),
                  pl.BlockSpec((1, 1, 1), lambda b, t: (b, 0, 0)),
                  pl.BlockSpec((1, 1, 1), lambda b, t: (b, 0, 0))],
        out_specs=pl.BlockSpec((1, tile_rows, lanes), lambda b, t: (b, t, 0)),
        compiler_params=pltpu.CompilerParams(
            dimension_semantics=("parallel", "parallel"),
            vmem_limit_bytes=_VMEM_LIMIT_BYTES),
    )(x3, mn, mx)


# ---------------------------------------------------------------------------
# Sizing helpers (trace-time Python, static shapes)
# ---------------------------------------------------------------------------
def _round_up(x, m):
    return -(-x // m) * m


def _pick_group(batch, sample_bytes, target_bytes):
    """Largest divisor of `batch` whose grouped block stays within target_bytes."""
    g_max = max(1, min(batch, target_bytes // max(sample_bytes, 1)))
    for g in range(g_max, 0, -1):
        if batch % g == 0:
            return g
    return 1


def _pick_tile_rows(rows, max_tile, min_tile):
    """Row tile (multiple of 8) dividing `rows`; else fall back to bounded padding."""
    t = min(max_tile, rows)
    t -= t % 8
    lo = max(min_tile, 8)
    while t >= lo:
        if rows % t == 0:
            return t, 0
        t -= 8
    padded = _round_up(rows, max_tile)
    return max_tile, padded - rows


# ---------------------------------------------------------------------------
# Public entry points
# ---------------------------------------------------------------------------
@functools.partial(
    jax.jit,
    static_argnames=("min_r", "max_r", "single_pass_max_bytes", "tile_rows_max"))
def _scale_batched(feature, *, min_r: float, max_r: float,
                   single_pass_max_bytes: int = _SINGLE_PASS_MAX_BYTES,
                   tile_rows_max: int = _TILE_ROWS):
    """Per-sample min-max rescale of a (B, seq, hidden) stack."""
    B, S, H = feature.shape
    n = S * H
    sample_bytes = n * jnp.dtype(feature.dtype).itemsize
    single_pass = sample_bytes <= single_pass_max_bytes

    rows = _round_up(n, _LANE) // _LANE            # lane-dense rows per sample
    if single_pass:
        tile_rows, extra_rows = rows, 0            # whole sample is one block
    else:
        tile_rows, extra_rows = _pick_tile_rows(
            rows, max_tile=tile_rows_max, min_tile=max(8, tile_rows_max // 8))
    rows_padded = rows + extra_rows
    pad = rows_padded * _LANE - n

    flat = feature.reshape(B, n)
    if pad:
        # 'edge' padding repeats an in-sample value → per-sample min/max unchanged.
        flat = jnp.pad(flat, ((0, 0), (0, pad)), mode="edge")
    x3 = flat.reshape(B, rows_padded, _LANE)

    if single_pass:
        group = _pick_group(B, sample_bytes, _GROUP_TARGET_BYTES)
        out3 = _scale_single_pass(x3, min_r, max_r, group)
    else:
        out3 = _scale_two_pass(x3, min_r, max_r, tile_rows)

    out = out3.reshape(B, rows_padded * _LANE)
    if pad:
        out = out[:, :n]
    return out.reshape(B, S, H)


def scale_pallas(feature: jax.Array, min_r: float = 0.0, max_r: float = 1.0, *,
                 single_pass_max_bytes: int = _SINGLE_PASS_MAX_BYTES,
                 tile_rows_max: int = _TILE_ROWS) -> jax.Array:
    """Pallas equivalent of `scale(feature, min_r, max_r)` (global min-max scaling).

    Accepts a single (seq, hidden) sample or a (batch, seq, hidden) stack; the
    batched form scales each sample independently (same per-sample semantics).
    """
    if not jnp.issubdtype(feature.dtype, jnp.floating):
        raise TypeError(
            f"Scale expects a floating-point feature tensor, got {feature.dtype}")
    min_r = float(min_r)
    max_r = float(max_r)
    kw = dict(min_r=min_r, max_r=max_r,
              single_pass_max_bytes=int(single_pass_max_bytes),
              tile_rows_max=int(tile_rows_max))
    if feature.ndim == 2:
        return _scale_batched(feature[None], **kw)[0]
    if feature.ndim == 3:
        return _scale_batched(feature, **kw)
    raise ValueError(
        f"expected (seq, hidden) or (batch, seq, hidden), got {feature.shape}")


class Scale:
    """JAX/Pallas re-implementation of the PyTorch `Scale` transform.

    The sample is a 5-tuple (sid, content, label, spacied, feature); only
    `feature` is transformed, the rest pass through untouched.

    NOTE: min_r / max_r are construction-time constants of the transform, so
    they are baked in as static floats (one compile per (min_r, max_r) pair).
    """

    def __init__(self, min_r: float = 0.0, max_r: float = 1.0) -> None:
        self.min_r = float(min_r)
        self.max_r = float(max_r)

    def forward(self, sample):
        sid, content, label, spacied, feature = sample
        feature = scale_pallas(feature, min_r=self.min_r, max_r=self.max_r)
        return (sid, content, label, spacied, feature)

    __call__ = forward


# ---------------------------------------------------------------------------
# Pure-JAX reference and self-test
# ---------------------------------------------------------------------------
def _scale_ref(feature, min_r: float = 0.0, max_r: float = 1.0):
    f = feature.astype(jnp.float32)
    squeeze = f.ndim == 2
    if squeeze:
        f = f[None]
    fmin = f.min(axis=(1, 2), keepdims=True)
    fmax = f.max(axis=(1, 2), keepdims=True)
    rng = fmax - fmin
    out = (f - fmin) / jnp.where(rng > 0, rng, 1.0) * (max_r - min_r) + min_r
    out = out.astype(feature.dtype)
    return out[0] if squeeze else out


if __name__ == "__main__":
    key = jax.random.PRNGKey(0)
    k1, k2, k3, k4 = jax.random.split(key, 4)
    TOL = dict(atol=1e-5, rtol=1e-5)   # exact divide in-kernel → tight tolerance

    transform = Scale(min_r=0.0, max_r=1.0)

    # 1) single sample (seq=8, hidden=32) through the transform tuple API
    feature = jax.random.normal(k1, (8, 32), dtype=jnp.float32) * 3.0 + 1.5
    sample = (7, jnp.arange(8, dtype=jnp.int32), 1, jnp.ones((8,), jnp.float32), feature)
    sid, content, label, spacied, out_feat = transform(sample)
    jax.block_until_ready(out_feat)
    assert out_feat.shape == feature.shape and out_feat.dtype == feature.dtype
    assert jnp.allclose(out_feat, _scale_ref(feature), **TOL), "single-sample mismatch"
    assert sid == 7 and label == 1

    # 2) batched stack, non-default range (the previously failing case)
    batched = jax.random.normal(k2, (4, 8, 32), dtype=jnp.float32) * 2.0 - 0.5
    out_b = scale_pallas(batched, min_r=-1.0, max_r=1.0)
    jax.block_until_ready(out_b)
    assert jnp.allclose(out_b, _scale_ref(batched, -1.0, 1.0), **TOL), "batched mismatch"

    # 3) batched + hidden not a multiple of 128 (edge padding + sample grouping)
    odd = jax.random.normal(k3, (3, 8, 24), dtype=jnp.float32)
    out_odd = scale_pallas(odd)
    jax.block_until_ready(out_odd)
    assert jnp.allclose(out_odd, _scale_ref(odd), **TOL), "padded-sample mismatch"

    # 4) constant tensor (range == 0) maps to min_r
    const = jnp.full((8, 32), 2.5, dtype=jnp.float32)
    out_c = scale_pallas(const)
    jax.block_until_ready(out_c)
    assert jnp.allclose(out_c, jnp.zeros_like(const), atol=1e-6), "constant-tensor guard failed"

    # 5) two-pass (parallel partial min/max + apply) path, forced at a small size
    two = jax.random.normal(k4, (2, 64, 128), dtype=jnp.float32) * 4.0 + 0.25
    out_two = scale_pallas(two, min_r=0.0, max_r=2.0,
                           single_pass_max_bytes=1024, tile_rows_max=16)
    jax.block_until_ready(out_two)
    assert jnp.allclose(out_two, _scale_ref(two, 0.0, 2.0), **TOL), "two-pass mismatch"

    print("KERNEL_OK")
</pallas_src>

<mosaic_0001>
module attributes {stable_mosaic.version = 11 : i64} {
  func.func @_scale_block_kernel(%arg0: i32, %arg1: memref<1x2x128xf32, #tpu.memory_space<vmem>>, %arg2: memref<1x2x128xf32, #tpu.memory_space<vmem>>) attributes {dimension_semantics = [#tpu.dimension_semantics<parallel>], iteration_bounds = array<i64: 1>, scalar_prefetch = 0 : i64, scratch_operands = 0 : i64, tpu.core_type = #tpu.core_type<tc>, window_params = [{transform_indices = @transform_0, window_bounds = array<i64: 1, 2, 128>}, {transform_indices = @transform_1, window_bounds = array<i64: 1, 2, 128>}]} {
    %c0 = arith.constant 0 : index
    %c0_0 = arith.constant 0 : index
    %c0_1 = arith.constant 0 : index
    %0 = vector.load %arg1[%c0, %c0_0, %c0_1] : memref<1x2x128xf32, #tpu.memory_space<vmem>>, vector<1x2x128xf32>
    %cst = arith.constant dense<0x7F800000> : vector<1xf32>
    %1 = vector.multi_reduction <minimumf>, %0, %cst [1, 2] : vector<1x2x128xf32> to vector<1xf32>
    %2 = vector.shape_cast %1 : vector<1xf32> to vector<1x1x1xf32>
    %c0_2 = arith.constant 0 : index
    %c0_3 = arith.constant 0 : index
    %c0_4 = arith.constant 0 : index
    %3 = vector.load %arg1[%c0_2, %c0_3, %c0_4] : memref<1x2x128xf32, #tpu.memory_space<vmem>>, vector<1x2x128xf32>
    %cst_5 = arith.constant dense<0xFF800000> : vector<1xf32>
    %4 = vector.multi_reduction <maximumf>, %3, %cst_5 [1, 2] : vector<1x2x128xf32> to vector<1xf32>
    %5 = vector.shape_cast %4 : vector<1xf32> to vector<1x1x1xf32>
    %6 = arith.subf %5, %2 : vector<1x1x1xf32>
    %cst_6 = arith.constant 0.000000e+00 : f32
    %7 = vector.broadcast %cst_6 : f32 to vector<1x1x1xf32>
    %8 = arith.cmpf ogt, %6, %7 : vector<1x1x1xf32>
    %cst_7 = arith.constant 1.000000e+00 : f32
    %9 = vector.broadcast %cst_7 : f32 to vector<1x1x1xf32>
    %10 = arith.select %8, %6, %9 : vector<1x1x1xi1>, vector<1x1x1xf32>
    %cst_8 = arith.constant 1.000000e+00 : f32
    %11 = vector.broadcast %cst_8 : f32 to vector<1x1x1xf32>
    %12 = arith.divf %11, %10 : vector<1x1x1xf32>
    %c0_9 = arith.constant 0 : index
    %c0_10 = arith.constant 0 : index
    %c0_11 = arith.constant 0 : index
    %13 = vector.load %arg1[%c0_9, %c0_10, %c0_11] : memref<1x2x128xf32, #tpu.memory_space<vmem>>, vector<1x2x128xf32>
    %14 = vector.broadcast %2 : vector<1x1x1xf32> to vector<1x2x128xf32>
    %15 = arith.subf %13, %14 : vector<1x2x128xf32>
    %16 = vector.broadcast %12 : vector<1x1x1xf32> to vector<1x2x128xf32>
    %17 = arith.mulf %15, %16 : vector<1x2x128xf32>
    %cst_12 = arith.constant 0.000000e+00 : f32
    %18 = vector.broadcast %cst_12 : f32 to vector<1x2x128xf32>
    %19 = arith.addf %17, %18 : vector<1x2x128xf32>
    %c0_13 = arith.constant 0 : index
    %c0_14 = arith.constant 0 : index
    %c0_15 = arith.constant 0 : index
    %20 = vector.load %arg2[%c0_13, %c0_14, %c0_15] : memref<1x2x128xf32, #tpu.memory_space<vmem>>, vector<1x2x128xf32>
    tpu.vector_store %arg2[%c0_13, %c0_14, %c0_15], %19 {strides = array<i32>} : memref<1x2x128xf32, #tpu.memory_space<vmem>>, vector<1x2x128xf32>,
    return
  }
  func.func @transform_0(%arg0: i32) -> (i32, i32, i32) {
    %c0_i32 = arith.constant 0 : i32
    %c0_i32_0 = arith.constant 0 : i32
    %c0_i32_1 = arith.constant 0 : i32
    return %arg0, %c0_i32, %c0_i32_0 : i32, i32, i32
  }
  func.func @transform_1(%arg0: i32) -> (i32, i32, i32) {
    %c0_i32 = arith.constant 0 : i32
    %c0_i32_0 = arith.constant 0 : i32
    %c0_i32_1 = arith.constant 0 : i32
    return %arg0, %c0_i32, %c0_i32_0 : i32, i32, i32
  }
}

</mosaic_0001>

<bundles_post_ra>
// kernel: _scale_batched.1
= control target key start
LH: loop header
LB: loop body
LE: loop exit
PB: predicated region body
PF: predicated region fallthrough
CT: control target
= control target key end

     0   :  { %vm9_vm0 = vcmask 1041408   ;;  %s59_s0 = inlined_call_operand.vmem [shape: f32[1,2,128], index: 0, kind: input, shape index: {}]   ;;  %s60_s1 = inlined_call_operand.vmem [shape: f32[1,2,128], index: 1, kind: output, shape index: {}]  }
   0x1   :  { %v8_v0 = vld [vmem:[%s59_s0] sm:$0x3] }
   0x2   :  { %v10_v1 = vsel %vm9_vm0, %v8_v0, inf  ;;  %v19_v2 = vsel %vm9_vm0, %v8_v0, -inf }
   0x3   :  { %11 = vmin.xlane.f32.xlu0 %v10_v1 }
   0x7   :  { %20 = vmax.xlane.f32.xlu0 %v19_v2 }
  0x90   :  { %v12_v3 = vpop.xlane.xlu0 %11 }
  0x91   :  { %v13_v4 = vrot.slane %v12_v3, 4 }
  0x93   :  { %v14_v5 = vmin.f32 %v12_v3, %v13_v4 }
  0x94   :  { %v21_v6 = vpop.xlane.xlu0 %20 }
  0x95   :  { %v15_v7 = vrot.slane %v14_v5, 2  ;;  %v22_v8 = vrot.slane %v21_v6, 4 }
  0x97   :  { %v16_v9 = vmin.f32 %v14_v5, %v15_v7  ;;  %v23_v10 = vmax.f32 %v21_v6, %v22_v8 }
  0x99   :  { %v24_v11 = vrot.slane %v23_v10, 2  ;;  %v17_v12 = vrot.slane %v16_v9, 1 }
  0x9b   :  { %v25_v13 = vmax.f32 %v23_v10, %v24_v11  ;;  %v18_v15 = vmin.f32 %v16_v9, %v17_v12 }
  0x9d   :  { %v26_v14 = vrot.slane %v25_v13, 1  ;;  %v33_v19 = vsub.f32 %v8_v0, %v18_v15 }
  0x9f   :  { %v27_v16 = vmax.f32 %v25_v13, %v26_v14 }
  0xa1   :  { %v28_v17 = vsub.f32 %v27_v16, %v18_v15 }
  0xa3   :  { %vm29_vm1 = vcmp.gt.f32.partialorder %v28_v17, 0.0 }
  0xa4   :  { %v30_v18 = vsel %vm29_vm1, %v28_v17, 1.0 }
  0xa5   :  { %41 = vrcp.f32 %v30_v18 }
  0xaf   :  { %v42_v20 = vpop.eup %41 }
  0xb0   :  { %v34_v21 = vmul.f32 %v42_v20, %v33_v19 }
  0xb2   :  { %36 = vst [vmem:[%s60_s1] sm:$0x3] %v34_v21 }

</bundles_post_ra>
